<compile_context>
chip_gen: v7x
topology: tpu7x:2x2x1
jax: 0.10.0
libtpu: 0.0.40
codegen_flags: <defaults>
</compile_context>

<pallas_src>
import jax
import jax.numpy as jnp
from jax.experimental import pallas as pl
from jax.experimental.pallas import tpu as pltpu

NUM_CLASSES = 100
S_TILE_MAX = 16384   # lane-dim cap: 100*16384*4 B = 6.25 MiB/block, double-
                     # buffered ~13 MiB -> fits v5e/v6e/v7x default scoped VMEM.


def _round_up(x: int, m: int) -> int:
    return ((x + m - 1) // m) * m


def _pick_s_tile(S: int):
    """Choose the spatial tile (lane dim, multiple of 128) and padded size."""
    if S % 128 == 0:
        # Divisor path: no padding, no post-kernel crop copy.
        divisors = [d for d in range(128, min(S, S_TILE_MAX) + 1, 128)
                    if S % d == 0]
        # Prefer the largest tile that still leaves >= 2 blocks so v7x
        # megacore can shard the spatial axis across its 2 TensorCores.
        multi = [d for d in divisors if S // d >= 2]
        s_tile = max(multi) if multi else max(divisors)
        return s_tile, S
    # Ragged S: pad to a multiple of s_tile, crop after the kernel.
    s_tile = min(_round_up(S, 128), S_TILE_MAX)
    return s_tile, _round_up(S, s_tile)


def _one_hot_kernel(t_ref, o_ref):
    # t_ref: (1, S_TILE)            int32 flattened labels (may contain -1)
    # o_ref: (NUM_CLASSES, S_TILE)  float32 one-hot slab (full class extent)
    c, s = o_ref.shape
    t = t_ref[...]                                   # (1, S_TILE)
    t = jnp.where(t == -1, jnp.int32(1), t)          # target[target == -1] = 1
    cls = jax.lax.broadcasted_iota(jnp.int32, (c, s), 0)
    o_ref[...] = (cls == t).astype(jnp.float32)      # (1,S) broadcasts vs (C,S)


def make_dummy_segmentation_forward(target_image: jax.Array):
    """Builds the module: precomputes `prediction` via the Pallas kernel.

    target_image: (H, W) integer labels in [-1, NUM_CLASSES).
    Returns forward(x) that ignores x, like the PyTorch module.
    """
    H, W = target_image.shape
    S = H * W

    t_flat = target_image.astype(jnp.int32).reshape(1, S)

    s_tile, s_pad = _pick_s_tile(S)
    if s_pad != S:
        # Pad with label 0; padded columns are cropped below (required!).
        t_flat = jnp.pad(t_flat, ((0, 0), (0, s_pad - S)), constant_values=0)

    n_s = s_pad // s_tile
    assert s_pad % s_tile == 0

    cost = pl.CostEstimate(
        flops=S * NUM_CLASSES,              # compare+select per (class, pixel)
        transcendentals=0,
        bytes_accessed=4 * s_pad * (1 + NUM_CLASSES),
    )

    pred_flat = pl.pallas_call(
        _one_hot_kernel,
        out_shape=jax.ShapeDtypeStruct((NUM_CLASSES, s_pad), jnp.float32),
        grid=(n_s,),
        in_specs=[pl.BlockSpec((1, s_tile), lambda j: (0, j))],
        out_specs=pl.BlockSpec((NUM_CLASSES, s_tile), lambda j: (0, j)),
        compiler_params=pltpu.CompilerParams(
            dimension_semantics=("parallel",),
            vmem_limit_bytes=32 << 20),
        cost_estimate=cost,
    )(t_flat)

    if s_pad == S:
        # Zero-cost view: (100, S) -> (1, 100, H, W) is a contiguous reshape.
        prediction = pred_flat.reshape(1, NUM_CLASSES, H, W)
    else:
        # Ragged S only: crop the padded (label-0) columns, then reshape.
        prediction = pred_flat[:, :S].reshape(1, NUM_CLASSES, H, W)

    def forward(x):
        # forward ignores x and returns the precomputed float prediction.
        return prediction

    return forward


def _reference(target_image: jax.Array) -> jax.Array:
    t = jnp.where(target_image == -1, 1, target_image).astype(jnp.int32)
    oh = jax.nn.one_hot(t, NUM_CLASSES, dtype=jnp.float32)  # (H, W, C)
    return jnp.transpose(oh, (2, 0, 1))[None]               # (1, C, H, W)


if __name__ == "__main__":
    key = jax.random.PRNGKey(0)
    k_t, k_x, k_t2 = jax.random.split(key, 3)

    # Primary small test: 16x16 labels in [-1, NUM_CLASSES); exercises the -1
    # remap and the crop-free divisor path (256 % 128 == 0 -> s_tile=128, n_s=2).
    H, W = 16, 16
    target_image = jax.random.randint(k_t, (H, W), minval=-1, maxval=NUM_CLASSES,
                                      dtype=jnp.int32)
    x = jax.random.normal(k_x, (2, 3, H, W), dtype=jnp.float32)  # ignored

    forward = make_dummy_segmentation_forward(target_image)
    out = jax.block_until_ready(forward(x))
    ref = jax.block_until_ready(_reference(target_image))
    assert out.shape == (1, NUM_CLASSES, H, W), out.shape
    assert out.dtype == jnp.float32, out.dtype
    assert bool(jnp.all(out == ref)), "mismatch vs reference one-hot (16x16)"

    # Second test exercising the ragged pad+crop path (40*40 = 1600, not %128).
    H2, W2 = 40, 40
    target_image2 = jax.random.randint(k_t2, (H2, W2), minval=-1,
                                       maxval=NUM_CLASSES, dtype=jnp.int32)
    forward2 = make_dummy_segmentation_forward(target_image2)
    out2 = jax.block_until_ready(forward2(x))
    ref2 = jax.block_until_ready(_reference(target_image2))
    assert out2.shape == (1, NUM_CLASSES, H2, W2), out2.shape
    assert bool(jnp.all(out2 == ref2)), "mismatch vs reference one-hot (40x40)"

    print("KERNEL_OK")
</pallas_src>

<mosaic_0001>
module attributes {stable_mosaic.version = 11 : i64} {
  func.func @_one_hot_kernel(%arg0: i32, %arg1: memref<1x128xi32, #tpu.memory_space<vmem>>, %arg2: memref<100x128xf32, #tpu.memory_space<vmem>>) attributes {dimension_semantics = [#tpu.dimension_semantics<parallel>], iteration_bounds = array<i64: 2>, scalar_prefetch = 0 : i64, scratch_operands = 0 : i64, tpu.core_type = #tpu.core_type<tc>, window_params = [{transform_indices = @transform_0, window_bounds = array<i64: 1, 128>}, {transform_indices = @transform_1, window_bounds = array<i64: 100, 128>}]} {
    %c0 = arith.constant 0 : index
    %c0_0 = arith.constant 0 : index
    %0 = vector.load %arg1[%c0, %c0_0] : memref<1x128xi32, #tpu.memory_space<vmem>>, vector<1x128xi32>
    %c-1_i32 = arith.constant -1 : i32
    %1 = vector.broadcast %c-1_i32 : i32 to vector<1x128xi32>
    %2 = arith.cmpi eq, %0, %1 : vector<1x128xi32>
    %c1_i32 = arith.constant 1 : i32
    %3 = vector.broadcast %c1_i32 : i32 to vector<1x128xi32>
    %4 = arith.select %2, %3, %0 : vector<1x128xi1>, vector<1x128xi32>
    %5 = tpu.iota {dimensions = array<i32: 0>} : vector<100x128xi32>
    %6 = vector.broadcast %4 : vector<1x128xi32> to vector<100x128xi32>
    %7 = arith.cmpi eq, %5, %6 : vector<100x128xi32>
    %8 = arith.extui %7 : vector<100x128xi1> to vector<100x128xi32>
    %9 = arith.sitofp %8 : vector<100x128xi32> to vector<100x128xf32>
    %c0_1 = arith.constant 0 : index
    %c0_2 = arith.constant 0 : index
    %10 = vector.load %arg2[%c0_1, %c0_2] : memref<100x128xf32, #tpu.memory_space<vmem>>, vector<100x128xf32>
    tpu.vector_store %arg2[%c0_1, %c0_2], %9 {strides = array<i32>} : memref<100x128xf32, #tpu.memory_space<vmem>>, vector<100x128xf32>,
    return
  }
  func.func @transform_0(%arg0: i32) -> (i32, i32) {
    %c0_i32 = arith.constant 0 : i32
    %c0_i32_0 = arith.constant 0 : i32
    return %c0_i32, %arg0 : i32, i32
  }
  func.func @transform_1(%arg0: i32) -> (i32, i32) {
    %c0_i32 = arith.constant 0 : i32
    %c0_i32_0 = arith.constant 0 : i32
    return %c0_i32, %arg0 : i32, i32
  }
}

</mosaic_0001>

<bundles_post_ra>
// kernel: tpu_custom_call.1
= control target key start
LH: loop header
LB: loop body
LE: loop exit
PB: predicated region body
PF: predicated region fallthrough
CT: control target
= control target key end

     0   :  { %6 = vsyncpa [#allocation3], 0  ;;  %s651_s0 = inlined_call_operand.hbm [shape: s32[1,256], index: 0, kind: input, shape index: {}]   ;;  %s652_s1 = inlined_call_operand.hbm [shape: f32[100,256], index: 1, kind: output, shape index: {}]  }
   0x1   :  { %8 = vsyncpa [#allocation3 + $0x1], 0 }
   0x2   :  { %9 = vsyncpa [#allocation4], 0 }
   0x3   :  { %11 = vsyncpa [#allocation4 + $0x1], 0  ;;  %s471_s6 = smov 0   ;;  %s473_s7 = smov 0  }
   0x4   :  { %s475_s8 = smov 0   ;;  %s477_s9 = smov 0  }
   0x5 LB: > { %s492_s10 = sadd.s32 4294967295, %s453_s9   ;;  %s285_s11 = sadd.s32 4294967294, %s453_s9   ;;  %s453_s9 = sphi %s477_s9, %s667_s9   ;;  %s449_s8 = sphi %s475_s8, %s666_s8   ;;  %s445_s7 = sphi %s473_s7, %s665_s7   ;;  %s441_s6 = sphi %s471_s6, %s664_s6  }
   0x6   : > { %s496_s12 = sadd.s32 1, %s453_s9   ;;  %s24_s13 = sadd.s32 1, %s449_s8 }
   0x7   : > { %s21_s14 = ssub.s32 %s453_s9, %s496_s12  ;;  %p31_p0 = scmp.ne.s32.totalorder %s449_s8, %s445_s7 }
   0x8   : > { %p22_p1 = scmp.eq.s32.totalorder %s21_s14, 0  ;;  %p32_p2 = scmp.eq.s32.totalorder %s453_s9, 0 }
   0x9   : > { %p37_p3 = scmp.ne.s32.totalorder %s445_s7, %s441_s6  ;;  %p38_p4 = scmp.eq.s32.totalorder %s492_s10, 0 }
   0xa   : > { %s508_s15 = scalar_select %p22_p1, %s449_s8, %s24_s13  }
   0xb   : > { %p510_p5 = por %p32_p2, %p31_p0  ;;  %p514_p6 = por %p38_p4, %p37_p3 }
   0xc   : > { %p61_p7 = scmp.eq.s32.totalorder %s492_s10, 1  ;;  %p67_p8 = scmp.eq.s32.totalorder %s285_s11, 1 }
   0xd   : > { %p319_p10 = scmp.lt.s32.totalorder %s453_s9, 2  ;;  %s87_s20 = sand.u32 1, %s449_s8  }
   0xe   : > { %p521_p11 = por %p61_p7, %p31_p0  ;;  %p525_p12 = por %p67_p8, %p37_p3 }
   0xf   : > { %s288_s21 = sshll.u32 %s453_s9, 4  ;;  %s90_s25 = scalar_lea.vmem [#allocation2], %s87_s20 }
  0x10   : > { %s656_s18 = scalar_select %p521_p11, 1, 0 }
  0x11   : > { %s657_s19 = scalar_select %p525_p12, 1, 0 }
  0x12   : > { %s534_s24 = scalar_lea.hbm %s651_s0, %s288_s21  ;;  %s97_s26 = sshll.u32 %s90_s25, 4  ;;  %s536_s26 = int_to_ptr.vmem [resolvable:$true] %s97_s26 }
  0x13   : > { %p540_p13 = pnand %p319_p10, %p510_p5  ;;  %s88_s28 = scalar_lea.sflag [#allocation3], %s87_s20 }
  0x14   : > { %s357_s29 = scalar_lea.hbm %s534_s24, 16  ;;  %s362_s3 = scalar_lea.hbm %s651_s0, 32 }
  0x15   : > { %p358_p2 = scmp.ne.s32.totalorder %s534_s24, %s357_s29  ;;  %p359_p3 = pneg %p540_p13 }
  0x16   : > { %p363_p5 = scmp.lt.u32.totalorder %s534_s24, %s651_s0  ;;  %p364_p8 = scmp.lt.u32.totalorder %s362_s3, %s357_s29 }
  0x17   : > { %p360_p4 = pnand %p359_p3, %p358_p2  ;;  %p366_p9 = scmp.lt.u32.totalorder %s357_s29, %s534_s24 }
  0x18   : > { %p365_p10 = por %p364_p8, %p363_p5 }
  0x19   : > { %p361_p7 = pneg %p360_p4 }
  0x1a   : > { %p367_p0 = por %p366_p9, %p365_p10 }
  0x1c   : > { %p368_p1 = pnand %p367_p0, %p361_p7 }
  0x1e   : > { %371 = shalt.err (!%p368_p1)
}
  0x1f   : > { %s372_s11 = scalar_lea.vmem %s536_s26, 16  ;;  %s455_s13 = smov [#allocation2]  }
  0x20   : > { %p373_p2 = scmp.ne.s32.totalorder %s536_s26, %s372_s11  ;;  %s377_s14 = sshll.u32 %s455_s13, 4  ;;  %s378_s14 = int_to_ptr.vmem [resolvable:$false] %s377_s14 }
  0x21   : > { %s379_s16 = scalar_lea.vmem %s378_s14, 32  ;;  %p380_p11 = scmp.lt.s32.totalorder %s536_s26, %s378_s14 }
  0x22   : > { %p375_p4 = pnand %p373_p2, %p359_p3  ;;  %p381_p5 = scmp.lt.s32.totalorder %s379_s16, %s372_s11 }
  0x24   : > { %p376_p12 = pneg %p375_p4  ;;  %p382_p8 = por %p381_p5, %p380_p11 }
  0x26   : > { %p383_p9 = pnand %p382_p8, %p376_p12 }
  0x28   : > { %386 = shalt.err (!%p383_p9)
}
  0x29   : > { %314 = dma.hbm_to_vmem [thread:$0]  (!%p540_p13), %s534_s24, 16, %s536_s26, %s88_s28  }
  0x2a   : > { %p659_p0 = scmp.lt.s32.totalorder %s453_s9, 3  ;;  %p660_p1 = scmp.ge.s32.totalorder %s453_s9, 1 }
  0x2c   : > { %p103_p3 = pnand %p660_p1, %p659_p0 }
  0x2d   : > { %s576_s20 = sand.u32 (!%p103_p3), 1, %s445_s7  }
  0x2e   : > { %106 = sbr.rel (%p103_p3) target bundleno = 86 (0x56), region = 24  ;;  %s109_s21 = scalar_lea.sflag (!%p103_p3), [#allocation3], %s576_s20 }
  0x2f   : > { %s111_s22 = scalar_lea.vmem (!%p103_p3), [#allocation2], %s576_s20 }
  0x35   : > { %432 = dma.done.wait (%p514_p6), %s109_s21, 16  }
  0x36   : > { %434 = vsyncadd (%p514_p6), %s109_s21, 4294967280  ;;  %v132_v0 = vlaneseq  ;;  %s306_s23 = smul.u32 104, %s576_s20  ;;  %v129_v3 = vld [vmem:[%s111_s22] sm:$0x1]  ;;  %v456_v18 = vmov 0.0   ;;  %s303_s24 = sshll.u32 %s492_s10, 7 }
  0x37   : > { %vm130_vm0 = vcmp.eq.s32.totalorder %v129_v3, 4294967295  ;;  %s600_s27 = scalar_lea.hbm %s652_s1, %s303_s24  ;;  %s203_s28 = scalar_lea.sflag [#allocation4], %s576_s20 }
  0x38   : > { %v133_v1 = vshrl.u32 %v132_v0, 7  ;;  %v131_v7 = vsel %vm130_vm0, 1, %v129_v3  ;;  %s585_s17 = scalar_lea.vmem [#allocation5], %s306_s23  ;;  %p661_p11 = scmp.ne.s32.totalorder %s656_s18, 0 }
  0x39   : > { %s215_s25 = sshll.u32 %s585_s17, 4  ;;  %s457_s30 = smov [#allocation5]   ;;  %s602_s25 = int_to_ptr.vmem [resolvable:$true] %s215_s25 }
  0x3a   : > { %v148_v2 = vsub.s32 0, %v133_v1  ;;  %v134_v4 = vadd.s32 8, %v133_v1  ;;  %v135_v5 = vadd.s32 16, %v133_v1  ;;  %v136_v6 = vadd.s32 24, %v133_v1  ;;  %s387_s29 = scalar_lea.vmem %s602_s25, 1664  ;;  %s391_s2 = sshll.u32 %s457_s30, 4  ;;  %s392_s2 = int_to_ptr.vmem [resolvable:$false] %s391_s2 }
  0x3b   : > { %v137_v8 = vadd.s32 32, %v133_v1  ;;  %v138_v9 = vadd.s32 40, %v133_v1  ;;  %v139_v11 = vadd.s32 48, %v133_v1  ;;  %v140_v12 = vadd.s32 56, %v133_v1  ;;  %p388_p6 = scmp.ne.s32.totalorder %s602_s25, %s387_s29  ;;  %s393_s3 = scalar_lea.vmem %s392_s2, 3328 }
  0x3c   : > { %v149_v10 = vrot.slane %v131_v7, %v148_v2  ;;  %v141_v13 = vadd.s32 64, %v133_v1  ;;  %v142_v14 = vadd.s32 72, %v133_v1  ;;  %v143_v15 = vadd.s32 80, %v133_v1  ;;  %p394_p7 = scmp.lt.s32.totalorder %s602_s25, %s392_s2  ;;  %p395_p10 = scmp.lt.s32.totalorder %s393_s3, %s387_s29 }
  0x3d   : > { %v144_v16 = vadd.s32 88, %v133_v1  ;;  %v145_v17 = vadd.s32 96, %v133_v1  ;;  %p389_p12 = pnand %p388_p6, %p661_p11 }
  0x3e   : > { %vm150_vm1 = vcmp.eq.s32.totalorder %v133_v1, %v149_v10  ;;  %vm151_vm2 = vcmp.eq.s32.totalorder %v134_v4, %v149_v10  ;;  %vm152_vm3 = vcmp.eq.s32.totalorder %v135_v5, %v149_v10  ;;  %vm153_vm4 = vcmp.eq.s32.totalorder %v136_v6, %v149_v10  ;;  %p396_p2 = por %p395_p10, %p394_p7 }
  0x3f   : > { %v290_v19 = vsel %vm150_vm1, 1.0, %v456_v18  ;;  %v291_v20 = vsel %vm151_vm2, 1.0, %v456_v18  ;;  %v292_v21 = vsel %vm152_vm3, 1.0, %v456_v18  ;;  %v293_v22 = vsel %vm153_vm4, 1.0, %v456_v18  ;;  %p390_p13 = pneg %p389_p12 }
  0x40   : > { %189 = vst [vmem:[%s585_s17] sm:$0xff] %v290_v19  ;;  %190 = vst [vmem:[%s585_s17 + $0x8] sm:$0xff] %v291_v20  ;;  %vm154_vm5 = vcmp.eq.s32.totalorder %v137_v8, %v149_v10  ;;  %vm155_vm6 = vcmp.eq.s32.totalorder %v138_v9, %v149_v10  ;;  %vm156_vm7 = vcmp.eq.s32.totalorder %v139_v11, %v149_v10 }
  0x41   : > { %191 = vst [vmem:[%s585_s17 + $0x10] sm:$0xff] %v292_v21  ;;  %192 = vst [vmem:[%s585_s17 + $0x18] sm:$0xff] %v293_v22  ;;  %vm157_vm8 = vcmp.eq.s32.totalorder %v140_v12, %v149_v10  ;;  %v294_v23 = vsel %vm154_vm5, 1.0, %v456_v18  ;;  %v295_v24 = vsel %vm155_vm6, 1.0, %v456_v18  ;;  %v296_v25 = vsel %vm156_vm7, 1.0, %v456_v18  ;;  %p397_p4 = pnand %p396_p2, %p390_p13 }
  0x42   : > { %v297_v26 = vsel %vm157_vm8, 1.0, %v456_v18  ;;  %193 = vst [vmem:[%s585_s17 + $0x20] sm:$0xff] %v294_v23  ;;  %194 = vst [vmem:[%s585_s17 + $0x28] sm:$0xff] %v295_v24  ;;  %vm158_vm9 = vcmp.eq.s32.totalorder %v141_v13, %v149_v10  ;;  %vm159_vm10 = vcmp.eq.s32.totalorder %v142_v14, %v149_v10  ;;  %vm160_vm11 = vcmp.eq.s32.totalorder %v143_v15, %v149_v10 }
  0x43   : > { %195 = vst [vmem:[%s585_s17 + $0x30] sm:$0xff] %v296_v25  ;;  %196 = vst [vmem:[%s585_s17 + $0x38] sm:$0xff] %v297_v26  ;;  %vm161_vm12 = vcmp.eq.s32.totalorder %v144_v16, %v149_v10  ;;  %v298_v27 = vsel %vm158_vm9, 1.0, %v456_v18  ;;  %v299_v28 = vsel %vm159_vm10, 1.0, %v456_v18  ;;  %v300_v29 = vsel %vm160_vm11, 1.0, %v456_v18 }
  0x44   : > { %v301_v30 = vsel %vm161_vm12, 1.0, %v456_v18  ;;  %197 = vst [vmem:[%s585_s17 + $0x40] sm:$0xff] %v298_v27  ;;  %198 = vst [vmem:[%s585_s17 + $0x48] sm:$0xff] %v299_v28  ;;  %vm162_vm13 = vcmp.eq.s32.totalorder %v145_v17, %v149_v10 }
  0x45   : > { %199 = vst [vmem:[%s585_s17 + $0x50] sm:$0xff] %v300_v29  ;;  %200 = vst [vmem:[%s585_s17 + $0x58] sm:$0xff] %v301_v30  ;;  %v302_v31 = vsel %vm162_vm13, 1.0, %v456_v18 }
  0x46   : > { %201 = vst [vmem:[%s585_s17 + $0x60] sm:$0xf] %v302_v31 }
  0x47   : > { %400 = shalt.err (!%p397_p4)
}
  0x48   : > { %s401_s4 = scalar_lea.hbm %s600_s27, 1664  ;;  %s405_s13 = scalar_lea.hbm %s652_s1, 3328 }
  0x49   : > { %p402_p5 = scmp.ne.s32.totalorder %s600_s27, %s401_s4  ;;  %p406_p0 = scmp.lt.u32.totalorder %s600_s27, %s652_s1 }
  0x4a   : > { %p407_p1 = scmp.lt.u32.totalorder %s405_s13, %s401_s4  ;;  %p409_p6 = scmp.lt.u32.totalorder %s401_s4, %s600_s27 }
  0x4b   : > { %p403_p8 = pnand %p402_p5, %p661_p11 }
  0x4c   : > { %p408_p3 = por %p407_p1, %p406_p0 }
  0x4d   : > { %p404_p9 = pneg %p403_p8 }
  0x4e   : > { %p410_p12 = por %p409_p6, %p408_p3 }
  0x50   : > { %p411_p13 = pnand %p410_p12, %p404_p9 }
  0x52   : > { %414 = shalt.err (!%p411_p13)
}
  0x53   : > { %s458_s21 = smov 128   ;;  %s459_s22 = smov 256  }
  0x54   : > { %s460_s23 = smov 8  }
  0x55   : > { %309 = dma.vmem_to_hbm [thread:$0]  (%p661_p11), %s602_s25, 1664, %s600_s27, %s203_s28, %s458_s21, %s459_s22, %s460_s23  }
  0x56 PF: > { %s230_s17 = sand.u32 1, %s441_s6   ;;  %p662_p7 = scmp.ne.s32.totalorder %s657_s19, 0 }
  0x57   : > { %p663_p10 = scmp.ge.s32.totalorder %s453_s9, 2  ;;  %s231_s24 = scalar_lea.sflag [#allocation4], %s230_s17 }
  0x59   : > { %p316_p2 = pnand %p663_p10, %p662_p7 }
  0x5b   : > { %436 = dma.done.wait (!%p316_p2), %s231_s24, 1664  }
  0x5c   : > { %438 = vsyncadd (!%p316_p2), %s231_s24, 4294965632  ;;  %p14_p4 = scmp.ge.s32.totalorder %s496_s12, 4   ;;  %s664_s6 = smov %s445_s7 }
  0x5d   : > { %s665_s7 = smov %s449_s8  ;;  %s666_s8 = smov %s508_s15 }
  0x5e   : > { %s667_s9 = smov %s496_s12  ;;  %16 = sbr.rel (!%p14_p4) target bundleno = 5 (0x5), region = 69 }
  0x65   :  { %236 = vsyncpa [#allocation3], 1 }
  0x66   :  { %238 = vsyncpa [#allocation3 + $0x1], 1 }
  0x67   :  { %239 = vsyncpa [#allocation4], 1 }
  0x68   :  { %241 = vsyncpa [#allocation4 + $0x1], 1 }

</bundles_post_ra>
